<compile_context>
chip_gen: v6e
topology: v6e:2x2x1
jax: 0.10.0
libtpu: 0.0.40
codegen_flags: <defaults>
</compile_context>

<pallas_src>
import functools
import math

import jax
import jax.numpy as jnp
from jax.experimental import pallas as pl
from jax.experimental.pallas import tpu as pltpu


def _round_up(v, m):
    return ((v + m - 1) // m) * m


def _pick_tile(dim_pad, target, align, max_waste_frac=0.10):
    """Largest multiple of `align` <= target whose padding waste on dim_pad is small."""
    cand = min(_round_up(max(target, align), align), dim_pad)
    while cand > align:
        waste = _round_up(dim_pad, cand) - dim_pad
        if waste <= max_waste_frac * dim_pad:
            return cand
        cand -= align
    return align


def _discriminator_kernel(x_ref, summary_ref, w_ref, o_ref, acc_ref, *, mxu_dtype):
    j = pl.program_id(1)

    @pl.when(j == 0)
    def _():
        acc_ref[...] = jnp.zeros_like(acc_ref)

    s = summary_ref[...]
    w = w_ref[...]
    if mxu_dtype is not None:
        s = s.astype(mxu_dtype)
        w = w.astype(mxu_dtype)

    # Partial h for this hidden-column tile: (TM, H) @ (H, TJ) on the MXU, f32 accumulate.
    h = jnp.dot(s, w, preferred_element_type=jnp.float32)
    prod = x_ref[...].astype(jnp.float32) * h              # (TM, TJ)

    # Lane-dense accumulation: VPU adds of static, 128-lane-aligned chunks; the
    # cross-lane (XLU) reduction is deferred to the finalize branch below.
    acc = acc_ref[...]
    for k in range(prod.shape[1] // 128):
        acc = acc + prod[:, k * 128:(k + 1) * 128]
    acc_ref[...] = acc

    @pl.when(j == pl.num_programs(1) - 1)
    def _():
        o_ref[...] = jnp.sum(acc_ref[...], axis=1, keepdims=True).astype(o_ref.dtype)


def discriminator_forward(x, summary, weight, *, tm=256, tj=512, mxu_dtype=jnp.bfloat16):
    """x: (N, H), summary: (N, H), weight: (H, H) -> (N,)"""
    n, h = x.shape
    assert summary.shape == (n, h)
    assert weight.shape == (h, h)

    itemsize = 4  # inputs are f32

    # Scoped-VMEM budget from the actual part (64 MiB on v7x, 128 MiB on v5e/v6e).
    try:
        vmem_cap = int(pltpu.get_tpu_info().vmem_capacity_bytes)
    except Exception:  # pragma: no cover - conservative fallback
        vmem_cap = 64 << 20
    scoped_cap = min((vmem_cap * 3) // 4, 112 << 20)

    n8 = _round_up(n, 8)
    h128 = _round_up(h, 128)

    # Row tile: multiple of 8 with bounded padding waste; prefer >= 2 row tiles so the
    # "parallel" row axis can shard across v7x's two TensorCores.
    tm_eff = _pick_tile(n8, min(tm, n8), 8)
    if n8 >= 16 and _round_up(n8, tm_eff) // tm_eff < 2:
        tm_eff = _pick_tile(n8, max(8, tm_eff // 2), 8)
    n_pad = _round_up(n8, tm_eff)

    def est_vmem(tm_e, tj_e, hp):
        # double-buffered x / summary / weight blocks + output + (TM,128) accumulator
        return itemsize * (2 * tm_e * tj_e + 2 * tm_e * hp + 2 * hp * tj_e
                           + 2 * tm_e + tm_e * 128)

    # Keep the full weight VMEM-resident (fetched exactly once) whenever it fits.
    if est_vmem(tm_eff, h128, h128) + (2 << 20) <= scoped_cap:
        tj_eff, h_pad = h128, h128
    else:
        tj_eff = _pick_tile(h128, min(tj, h128), 128)
        while (est_vmem(tm_eff, tj_eff, _round_up(h128, tj_eff)) + (2 << 20) > scoped_cap
               and tj_eff > 128):
            tj_eff = max(128, (tj_eff // 2) // 128 * 128)
        while (est_vmem(tm_eff, tj_eff, _round_up(h128, tj_eff)) + (2 << 20) > scoped_cap
               and tm_eff > 8):
            tm_eff = max(8, (tm_eff // 2) // 8 * 8)
            n_pad = _round_up(n8, tm_eff)
        h_pad = _round_up(h128, tj_eff)

    gm = n_pad // tm_eff
    gj = h_pad // tj_eff

    # Pad only when necessary (zero padding contributes exactly zero to the reduction).
    if (n_pad, h_pad) != (n, h):
        x_p = jnp.pad(x, ((0, n_pad - n), (0, h_pad - h)))
        s_p = jnp.pad(summary, ((0, n_pad - n), (0, h_pad - h)))
    else:
        x_p, s_p = x, summary
    w_p = jnp.pad(weight, ((0, h_pad - h), (0, h_pad - h))) if h_pad != h else weight

    needed = est_vmem(tm_eff, tj_eff, h_pad)
    vmem_limit = int(min(scoped_cap, max(needed + (4 << 20), 16 << 20)))

    weight_passes = 1 if gj == 1 else gm  # gj==1 -> constant block index -> single fetch
    cost = pl.CostEstimate(
        flops=2 * n_pad * h_pad * h_pad + 2 * n_pad * h_pad,
        transcendentals=0,
        bytes_accessed=itemsize * (2 * n_pad * h_pad + weight_passes * h_pad * h_pad + n_pad),
    )

    kernel = functools.partial(_discriminator_kernel, mxu_dtype=mxu_dtype)

    out = pl.pallas_call(
        kernel,
        out_shape=jax.ShapeDtypeStruct((n_pad, 1), x.dtype),
        grid=(gm, gj),
        in_specs=[
            pl.BlockSpec((tm_eff, tj_eff), lambda i, j: (i, j)),  # x columns of tile j
            pl.BlockSpec((tm_eff, h_pad), lambda i, j: (i, 0)),   # summary rows (full H)
            pl.BlockSpec((h_pad, tj_eff), lambda i, j: (0, j)),   # weight (resident if gj==1)
        ],
        out_specs=pl.BlockSpec((tm_eff, 1), lambda i, j: (i, 0)),
        scratch_shapes=[pltpu.VMEM((tm_eff, 128), jnp.float32)],
        compiler_params=pltpu.CompilerParams(
            dimension_semantics=("parallel", "arbitrary"),
            vmem_limit_bytes=vmem_limit,
        ),
        cost_estimate=cost,
    )(x_p, s_p, w_p)
    return out[:n, 0]


def init_discriminator_weight(key, hidden_dim, dtype=jnp.float32):
    # Matches torch_geometric-style `uniform(size, weight)`:
    #   bound = 1/sqrt(size); weight ~ U(-bound, bound)
    bound = 1.0 / math.sqrt(hidden_dim)
    return jax.random.uniform(
        key, (hidden_dim, hidden_dim), dtype=dtype, minval=-bound, maxval=bound
    )


def _check(out, ref, tol):
    err = float(jnp.max(jnp.abs(out - ref)))
    scale = float(jnp.max(jnp.abs(ref))) + 1e-6
    assert err <= tol * scale, (err, scale)


if __name__ == "__main__":
    # Small shapes consistent with the module (hidden_dim=32, batch of 8 nodes).
    k_w, k_x, k_s = jax.random.split(jax.random.PRNGKey(0), 3)
    N, H = 8, 32
    weight = init_discriminator_weight(k_w, H)
    x = jax.random.normal(k_x, (N, H), dtype=jnp.float32)
    summary = jax.random.normal(k_s, (N, H), dtype=jnp.float32)
    ref = jnp.sum(x * (summary @ weight), axis=1)

    # f32 MXU-operand path (matches PyTorch numerics closely).
    out_f32 = jax.block_until_ready(discriminator_forward(x, summary, weight, mxu_dtype=None))
    assert out_f32.shape == (N,)
    _check(out_f32, ref, 2e-2)

    # Default bf16-operand / f32-accumulate MXU path.
    out_bf16 = jax.block_until_ready(discriminator_forward(x, summary, weight))
    _check(out_bf16, ref, 5e-2)

    # Larger ragged case: multiple row tiles, resident weight, padding only to (8,128).
    k_w2, k_x2, k_s2 = jax.random.split(jax.random.PRNGKey(1), 3)
    N2, H2 = 300, 200
    weight2 = init_discriminator_weight(k_w2, H2)
    x2 = jax.random.normal(k_x2, (N2, H2), dtype=jnp.float32)
    summary2 = jax.random.normal(k_s2, (N2, H2), dtype=jnp.float32)
    ref2 = jnp.sum(x2 * (summary2 @ weight2), axis=1)

    out2 = jax.block_until_ready(discriminator_forward(x2, summary2, weight2, mxu_dtype=None))
    assert out2.shape == (N2,)
    _check(out2, ref2, 2e-2)

    out2b = jax.block_until_ready(discriminator_forward(x2, summary2, weight2))
    _check(out2b, ref2, 5e-2)

    print("KERNEL_OK")
</pallas_src>

<mosaic_0001>
module attributes {stable_mosaic.version = 11 : i64} {
  func.func @_discriminator_kernel(%arg0: i32, %arg1: i32, %arg2: memref<8x128xf32, #tpu.memory_space<vmem>>, %arg3: memref<8x128xf32, #tpu.memory_space<vmem>>, %arg4: memref<128x128xf32, #tpu.memory_space<vmem>>, %arg5: memref<8x1xf32, #tpu.memory_space<vmem>>, %arg6: memref<8x128xf32, #tpu.memory_space<vmem>>) attributes {dimension_semantics = [#tpu.dimension_semantics<parallel>, #tpu.dimension_semantics<arbitrary>], iteration_bounds = array<i64: 1, 1>, scalar_prefetch = 0 : i64, scratch_operands = 1 : i64, tpu.core_type = #tpu.core_type<tc>, window_params = [{transform_indices = @transform_0, window_bounds = array<i64: 8, 128>}, {transform_indices = @transform_1, window_bounds = array<i64: 8, 128>}, {transform_indices = @transform_2, window_bounds = array<i64: 128, 128>}, {transform_indices = @transform_3, window_bounds = array<i64: 8, 1>}]} {
    %c0_i32 = arith.constant 0 : i32
    %0 = arith.cmpi eq, %arg1, %c0_i32 : i32
    %1 = arith.extui %0 : i1 to i32
    %c0_i32_0 = arith.constant 0 : i32
    %2 = arith.cmpi ne, %1, %c0_i32_0 : i32
    scf.if %2 {
      %cst_12 = arith.constant 0.000000e+00 : f32
      %14 = vector.broadcast %cst_12 : f32 to vector<8x128xf32>
      %c0_13 = arith.constant 0 : index
      %c0_14 = arith.constant 0 : index
      %15 = vector.load %arg6[%c0_13, %c0_14] : memref<8x128xf32, #tpu.memory_space<vmem>>, vector<8x128xf32>
      tpu.vector_store %arg6[%c0_13, %c0_14], %14 {strides = array<i32>} : memref<8x128xf32, #tpu.memory_space<vmem>>, vector<8x128xf32>,
    } else {
    }
    %c0 = arith.constant 0 : index
    %c0_1 = arith.constant 0 : index
    %3 = vector.load %arg3[%c0, %c0_1] : memref<8x128xf32, #tpu.memory_space<vmem>>, vector<8x128xf32>
    %c0_2 = arith.constant 0 : index
    %c0_3 = arith.constant 0 : index
    %4 = vector.load %arg4[%c0_2, %c0_3] : memref<128x128xf32, #tpu.memory_space<vmem>>, vector<128x128xf32>
    %cst = arith.constant dense<0.000000e+00> : vector<8x128xf32>
    %5 = tpu.matmul %3, %4, %cst {dimension_numbers = #tpu.dot_dimension_numbers<[1], [0], [0], [1], [0, 0, 1, 1], [], []>} : vector<8x128xf32>, vector<128x128xf32>, vector<8x128xf32> -> vector<8x128xf32>
    %c0_4 = arith.constant 0 : index
    %c0_5 = arith.constant 0 : index
    %6 = vector.load %arg2[%c0_4, %c0_5] : memref<8x128xf32, #tpu.memory_space<vmem>>, vector<8x128xf32>
    %7 = arith.mulf %6, %5 : vector<8x128xf32>
    %c0_6 = arith.constant 0 : index
    %c0_7 = arith.constant 0 : index
    %8 = vector.load %arg6[%c0_6, %c0_7] : memref<8x128xf32, #tpu.memory_space<vmem>>, vector<8x128xf32>
    %9 = arith.addf %8, %7 : vector<8x128xf32>
    %c0_8 = arith.constant 0 : index
    %c0_9 = arith.constant 0 : index
    %10 = vector.load %arg6[%c0_8, %c0_9] : memref<8x128xf32, #tpu.memory_space<vmem>>, vector<8x128xf32>
    tpu.vector_store %arg6[%c0_8, %c0_9], %9 {strides = array<i32>} : memref<8x128xf32, #tpu.memory_space<vmem>>, vector<8x128xf32>,
    %c0_i32_10 = arith.constant 0 : i32
    %11 = arith.cmpi eq, %arg1, %c0_i32_10 : i32
    %12 = arith.extui %11 : i1 to i32
    %c0_i32_11 = arith.constant 0 : i32
    %13 = arith.cmpi ne, %12, %c0_i32_11 : i32
    scf.if %13 {
      %c0_12 = arith.constant 0 : index
      %c0_13 = arith.constant 0 : index
      %14 = vector.load %arg6[%c0_12, %c0_13] : memref<8x128xf32, #tpu.memory_space<vmem>>, vector<8x128xf32>
      %cst_14 = arith.constant dense<0.000000e+00> : vector<8xf32>
      %15 = vector.multi_reduction <add>, %14, %cst_14 [1] : vector<8x128xf32> to vector<8xf32>
      %16 = vector.shape_cast %15 : vector<8xf32> to vector<8x1xf32>
      %c0_15 = arith.constant 0 : index
      %c0_16 = arith.constant 0 : index
      %17 = vector.load %arg5[%c0_15, %c0_16] : memref<8x1xf32, #tpu.memory_space<vmem>>, vector<8x1xf32>
      tpu.vector_store %arg5[%c0_15, %c0_16], %16 {strides = array<i32>} : memref<8x1xf32, #tpu.memory_space<vmem>>, vector<8x1xf32>,
    } else {
    }
    return
  }
  func.func @transform_0(%arg0: i32, %arg1: i32) -> (i32, i32) {
    %c0_i32 = arith.constant 0 : i32
    return %arg0, %arg1 : i32, i32
  }
  func.func @transform_1(%arg0: i32, %arg1: i32) -> (i32, i32) {
    %c0_i32 = arith.constant 0 : i32
    %c0_i32_0 = arith.constant 0 : i32
    return %arg0, %c0_i32 : i32, i32
  }
  func.func @transform_2(%arg0: i32, %arg1: i32) -> (i32, i32) {
    %c0_i32 = arith.constant 0 : i32
    %c0_i32_0 = arith.constant 0 : i32
    return %c0_i32, %arg1 : i32, i32
  }
  func.func @transform_3(%arg0: i32, %arg1: i32) -> (i32, i32) {
    %c0_i32 = arith.constant 0 : i32
    %c0_i32_0 = arith.constant 0 : i32
    return %arg0, %c0_i32 : i32, i32
  }
}

</mosaic_0001>

<bundles_post_ra>
// kernel: tpu_custom_call.1
= control target key start
LH: loop header
LB: loop body
LE: loop exit
PB: predicated region body
PF: predicated region fallthrough
CT: control target
= control target key end

     0   :  { %8 = vsyncpa [#allocation4], 0  ;;  %s324_s0 = inlined_call_operand.hbm [shape: f32[8,128], index: 0, kind: input, shape index: {}]   ;;  %s325_s1 = inlined_call_operand.hbm [shape: f32[8,128], index: 1, kind: input, shape index: {}]   ;;  %s326_s2 = inlined_call_operand.hbm [shape: f32[128,128], index: 2, kind: input, shape index: {}]   ;;  %s327_s3 = inlined_call_operand.vmem [shape: f32[8,1], index: 3, kind: output, shape index: {}]  }
   0x1   :  { %9 = vsyncpa [#allocation6], 0  ;;  %s285_s12 = smov [#allocation5]   ;;  %s286_s14 = smov [#allocation3]  }
   0x2   :  { %s26_s13 = sshll.u32 %s285_s12, 4  ;;  %s16_s15 = sshll.u32 %s286_s14, 4  ;;  %s27_s13 = int_to_ptr.vmem [resolvable:$true] %s26_s13  ;;  %s17_s15 = int_to_ptr.vmem [resolvable:$true] %s16_s15 }
   0x3   :  { %s229_s16 = scalar_lea.vmem %s27_s13, 128  ;;  %p234_p1 = scmp.lt.s32.totalorder %s27_s13, %s27_s13 }
   0x4   :  { %p230_p0 = scmp.ne.s32.totalorder %s27_s13, %s229_s16  ;;  %p235_p2 = scmp.lt.s32.totalorder %s229_s16, %s229_s16 }
   0x6   :  { %p236_p3 = por %p235_p2, %p234_p1 }
   0x8   :  { %p237_p4 = pnand %p236_p3, %p230_p0 }
   0xa   :  { %240 = shalt.err (!%p237_p4)
}
   0xb   :  { %29 = dma.hbm_to_vmem [thread:$0]  %s325_s1, 128, %s27_s13, [#allocation6]  }
   0xc   :  { %s249_s19 = scalar_lea.vmem %s17_s15, 128  ;;  %p254_p6 = scmp.lt.s32.totalorder %s17_s15, %s17_s15 }
   0xd   :  { %p250_p5 = scmp.ne.s32.totalorder %s17_s15, %s249_s19  ;;  %p255_p7 = scmp.lt.s32.totalorder %s249_s19, %s249_s19 }
   0xf   :  { %p256_p8 = por %p255_p7, %p254_p6 }
  0x11   :  { %p257_p9 = pnand %p256_p8, %p250_p5 }
  0x13   :  { %260 = shalt.err (!%p257_p9)
}
  0x14   :  { %19 = dma.hbm_to_vmem [thread:$0]  %s324_s0, 128, %s17_s15, [#allocation4]  }
  0x15   :  { %s287_s22 = smov [#allocation7]  }
  0x16   :  { %s35_s23 = sshll.u32 %s287_s22, 4  ;;  %s36_s23 = int_to_ptr.vmem [resolvable:$true] %s35_s23 }
  0x17   :  { %s269_s24 = scalar_lea.vmem %s36_s23, 2048  ;;  %p274_p11 = scmp.lt.s32.totalorder %s36_s23, %s36_s23 }
  0x18   :  { %p270_p10 = scmp.ne.s32.totalorder %s36_s23, %s269_s24  ;;  %p275_p12 = scmp.lt.s32.totalorder %s269_s24, %s269_s24 }
  0x1a   :  { %p276_p13 = por %p275_p12, %p274_p11 }
  0x1c   :  { %p277_p0 = pnand %p276_p13, %p270_p10 }
  0x1e   :  { %280 = shalt.err (!%p277_p0)
}
  0x1f   :  { %s288_s1 = smov 128   ;;  %s289_s25 = smov 8  }
  0x20   :  { %41 = dma.hbm_to_vmem [thread:$0]  %s326_s2, 2048, %s36_s23, [#allocation6], %s288_s1, %s288_s1, %s289_s25  }
  0x21   :  { %281 = dma.done.wait [#allocation4], 128  }
  0x22   :  { %282 = vsyncadd [#allocation4], 4294967168 }
  0x23   :  { %283 = dma.done.wait [#allocation6], 2176  }
  0x24   :  { %284 = vsyncadd [#allocation6], 4294965120  ;;  %v290_v0 = vmov 0.0   ;;  %vm291_vm0 = vmmov 0   ;;  %v72_v1 = vld [vmem:[#allocation7 + $0x78] sm:$0xff]  ;;  %v71_v2 = vld [vmem:[#allocation7 + $0x70] sm:$0xff] }
  0x25   :  { %179 = vmatprep.subr.mxu0 %v290_v0  ;;  %211 = vmatprep.mubr.msk.f32.mxu0 %vm291_vm0, %v290_v0  ;;  %v70_v3 = vld [vmem:[#allocation7 + $0x68] sm:$0xff]  ;;  %v69_v4 = vld [vmem:[#allocation7 + $0x60] sm:$0xff]  ;;  %v68_v5 = vld [vmem:[#allocation7 + $0x58] sm:$0xff]  ;;  %vm154_vm1 = vcmask 7168  }
  0x26   :  { %180 = vmatpush3.msra.mxu0 %v72_v1  ;;  %v67_v6 = vld [vmem:[#allocation7 + $0x50] sm:$0xff]  ;;  %v66_v7 = vld [vmem:[#allocation7 + $0x48] sm:$0xff]  ;;  %v65_v8 = vld [vmem:[#allocation7 + $0x40] sm:$0xff] }
  0x27   :  { %181 = vmatprep.subr.mxu0 %v290_v0  ;;  %v64_v9 = vld [vmem:[#allocation7 + $0x38] sm:$0xff]  ;;  %v63_v10 = vld [vmem:[#allocation7 + $0x30] sm:$0xff]  ;;  %v62_v11 = vld [vmem:[#allocation7 + $0x28] sm:$0xff] }
  0x28   :  { %182 = vmatpush3.msra.mxu0 %v71_v2  ;;  %v61_v12 = vld [vmem:[#allocation7 + $0x20] sm:$0xff]  ;;  %v60_v13 = vld [vmem:[#allocation7 + $0x18] sm:$0xff]  ;;  %v59_v14 = vld [vmem:[#allocation7 + $0x10] sm:$0xff] }
  0x29   :  { %183 = vmatprep.subr.mxu0 %v290_v0  ;;  %v58_v15 = vld [vmem:[#allocation7 + $0x8] sm:$0xff]  ;;  %v57_v16 = vld [vmem:[#allocation7] sm:$0xff]  ;;  %v56_v17 = vld [vmem:[#allocation5] sm:$0xff] }
  0x2a   :  { %184 = vmatpush3.msra.mxu0 %v70_v3  ;;  %v143_v18 = vld [vmem:[#allocation3] sm:$0xff] }
  0x2b   :  { %185 = vmatprep.subr.mxu0 %v290_v0 }
  0x2c   :  { %186 = vmatpush3.msra.mxu0 %v69_v4 }
  0x2d   :  { %187 = vmatprep.subr.mxu0 %v290_v0 }
  0x2e   :  { %188 = vmatpush3.msra.mxu0 %v68_v5 }
  0x2f   :  { %189 = vmatprep.subr.mxu0 %v290_v0 }
  0x30   :  { %190 = vmatpush3.msra.mxu0 %v67_v6 }
  0x31   :  { %191 = vmatprep.subr.mxu0 %v290_v0 }
  0x32   :  { %192 = vmatpush3.msra.mxu0 %v66_v7 }
  0x33   :  { %193 = vmatprep.subr.mxu0 %v290_v0 }
  0x34   :  { %194 = vmatpush3.msra.mxu0 %v65_v8 }
  0x35   :  { %195 = vmatprep.subr.mxu0 %v290_v0 }
  0x36   :  { %196 = vmatpush3.msra.mxu0 %v64_v9 }
  0x37   :  { %197 = vmatprep.subr.mxu0 %v290_v0 }
  0x38   :  { %198 = vmatpush3.msra.mxu0 %v63_v10 }
  0x39   :  { %199 = vmatprep.subr.mxu0 %v290_v0 }
  0x3a   :  { %200 = vmatpush3.msra.mxu0 %v62_v11 }
  0x3b   :  { %201 = vmatprep.subr.mxu0 %v290_v0 }
  0x3c   :  { %202 = vmatpush3.msra.mxu0 %v61_v12 }
  0x3d   :  { %203 = vmatprep.subr.mxu0 %v290_v0 }
  0x3e   :  { %204 = vmatpush3.msra.mxu0 %v60_v13 }
  0x3f   :  { %205 = vmatprep.subr.mxu0 %v290_v0 }
  0x40   :  { %206 = vmatpush3.msra.mxu0 %v59_v14 }
  0x41   :  { %207 = vmatprep.subr.mxu0 %v290_v0 }
  0x42   :  { %208 = vmatpush3.msra.mxu0 %v58_v15 }
  0x43   :  { %209 = vmatprep.subr.mxu0 %v290_v0 }
  0x44   :  { %210 = vmatpush3.msra.mxu0 %v57_v16 }
  0x45   :  { %212 = vmatmul.mubr.f32.vlgmr.msra.gmra.mxu0 %v56_v17 }
 0x105   :  { %v139_v19 = vpop.f32.mrf.mxu0 }
 0x106   :  { %v144_v20 = vmul.f32 %v143_v18, %v139_v19 }
 0x107   :  { %v213_v21 = vpop.f32.mrf.mxu0 }
 0x108   :  { %152 = vadd.xlane.f32.xlu0 %v144_v20 }
 0x191   :  { %v153_v22 = vpop.xlane.xlu0 %152 }
 0x192   :  { %155 = vst.msk [vmem:[%s327_s3] sm:$0xff] %vm154_vm1, %v153_v22 }
 0x193   :  { %160 = vsyncpa [#allocation4], 1 }
 0x194   :  { %161 = vsyncpa [#allocation6], 1 }

</bundles_post_ra>
